<compile_context>
chip_gen: v6e
topology: v6e:2x2x1
jax: 0.10.0
libtpu: 0.0.40
codegen_flags: <defaults>
</compile_context>

<pallas_src>
import functools

import jax
import jax.numpy as jnp
from jax.experimental import pallas as pl
from jax.experimental.pallas import tpu as pltpu


def _round_up(v, m):
    return ((v + m - 1) // m) * m


def _binary_head_kernel(h_out, precision, x_ref, w_ref, b_ref, o_ref):
    # x_ref: (TB, D)      VMEM, pipelined batch tile (double-buffered by Pallas)
    # w_ref: (Hp, D)      VMEM, resident (rows >= h_out are zero)
    # b_ref: (h_out, 1)   VMEM f32, resident
    # o_ref: (1, h_out, TB) VMEM, batch on the lane axis (lane-dense)
    acc = jax.lax.dot_general(
        w_ref[...], x_ref[...],
        dimension_numbers=(((1,), (1,)), ((), ())),   # (Hp,D) . (TB,D)^T -> (Hp,TB)
        preferred_element_type=jnp.float32,
        precision=precision,
    )
    out = acc[0:h_out, :] + b_ref[...]                # (h_out, TB) + (h_out, 1)
    o_ref[...] = out[None, :, :].astype(o_ref.dtype)


def _vmem_capacity_bytes():
    """Per-core physical VMEM (generation-aware); conservative fallback = v7x."""
    try:
        cap = int(getattr(pltpu.get_tpu_info(), "vmem_capacity_bytes", 0) or 0)
    except Exception:
        cap = 0
    if cap <= 0:
        cap = 64 * 1024 * 1024            # v7x per-TC; v5e/v6e report 128 MiB
    return min(max(cap, 32 * 1024 * 1024), 128 * 1024 * 1024)


def _choose_batch_tile(batch, input_dim, itemsize, h_out, vmem_cap):
    """Rows of x per grid step, sized in bytes with lane-padding-aware VMEM math."""
    sub = {4: 8, 2: 16, 1: 32}.get(itemsize, 8)       # dtype-native sublane multiple
    lane_d = _round_up(input_dim, 128)                # minor dim lane-pads in VMEM if D < 128
    h_pad = max(8, _round_up(h_out, 8))
    # Per tile row: double-buffered x tile + double-buffered (1, H, TB) output tile.
    per_row_vmem = 2 * lane_d * itemsize + 2 * h_pad * itemsize
    tb_vmem = (vmem_cap // 2) // per_row_vmem         # keep buffers in ~half of VMEM
    # ~8 MiB of *real* x payload per step amortizes the ~0.35 us per-step overhead.
    tb_payload = (8 * 1024 * 1024) // max(1, input_dim * itemsize)
    tb = max(sub, min(tb_vmem, tb_payload))
    tb = min(tb, _round_up(batch, sub))               # never exceed the padded batch
    if batch > sub:                                   # >= 2 tiles: feed both v7x TCs
        tb = min(tb, _round_up(-(-batch // 2), sub))
    if tb >= 128:
        tb = (tb // 128) * 128                        # lane-dense (unmasked) output stores
    else:
        tb = max(sub, (tb // sub) * sub)
    return int(tb)


def _vmem_limit_bytes(tb, input_dim, itemsize, h_out, vmem_cap):
    lane_d = _round_up(input_dim, 128)
    lane_tb = _round_up(tb, 128)
    h_pad = max(8, _round_up(h_out, 8))
    est = (2 * tb * lane_d * itemsize                 # x double buffer (lane padded)
           + 2 * h_pad * lane_tb * itemsize           # output double buffer
           + h_pad * lane_d * itemsize + 4096)        # resident weight + bias
    return int(min(vmem_cap, max(est + 8 * 1024 * 1024, 16 * 1024 * 1024)))


@functools.partial(
    jax.jit, static_argnames=("tb", "num_tiles", "h_out", "vmem_limit", "precision"))
def _pallas_forward(x, w_p, b_p, *, tb, num_tiles, h_out, vmem_limit, precision):
    _, d = x.shape
    h_pad = w_p.shape[0]
    kernel = functools.partial(_binary_head_kernel, h_out, precision)
    return pl.pallas_call(
        kernel,
        out_shape=jax.ShapeDtypeStruct((num_tiles, h_out, tb), x.dtype),
        grid=(num_tiles,),
        in_specs=[
            pl.BlockSpec((tb, d), lambda i: (i, 0)),        # x: pipelined batch tiles
            pl.BlockSpec((h_pad, d), lambda i: (0, 0)),     # weight: fetched once, resident
            pl.BlockSpec((h_out, 1), lambda i: (0, 0)),     # bias: tiny resident f32 block
        ],
        out_specs=pl.BlockSpec((1, h_out, tb), lambda i: (i, 0, 0)),  # batch on lanes
        compiler_params=pltpu.CompilerParams(
            dimension_semantics=("parallel",),
            vmem_limit_bytes=vmem_limit,
        ),
    )(x, w_p, b_p)


def binary_attribute_head(x, weight, bias, *, batch_tile=None, precision=None):
    """Forward of BinaryAttributeHead: logits = x @ weight.T + bias.

    x: (B, D).  weight: (H, D) in PyTorch nn.Linear layout (H == 1 for the
    module; H > 1 fuses several binary heads into one pass over x — the kernel
    is HBM-bound on x, so extra heads are ~free).  bias: (H,).
    Returns (B, H) logits in x.dtype ((B, 1) for the module).

    For strict fp32 parity with the PyTorch module at large D, pass
    precision=jax.lax.Precision.HIGHEST.
    """
    if weight.ndim == 1:
        weight = weight[None, :]
    batch, dim = x.shape
    h = weight.shape[0]
    itemsize = x.dtype.itemsize
    vmem_cap = _vmem_capacity_bytes()
    tb = int(batch_tile) if batch_tile is not None else _choose_batch_tile(
        batch, dim, itemsize, h, vmem_cap)
    num_tiles = int(pl.cdiv(batch, tb))
    vmem_limit = _vmem_limit_bytes(tb, dim, itemsize, h, vmem_cap)

    h_pad = max(8, _round_up(h, 8))            # sublane-aligned MXU lhs; extra rows zero
    w_p = jnp.pad(weight.astype(x.dtype), ((0, h_pad - h), (0, 0)))
    b_p = jnp.reshape(bias, (h, 1)).astype(jnp.float32)

    # No jnp.pad of x: the last (partial) tile uses Pallas OOB block handling;
    # rows are independent and the padded tail is sliced off below.
    out = _pallas_forward(x, w_p, b_p, tb=tb, num_tiles=num_tiles, h_out=h,
                          vmem_limit=vmem_limit, precision=precision)
    # out[i, h, t] holds the logit of row b = i*tb + t.
    return out.transpose(1, 0, 2).reshape(h, num_tiles * tb)[:, :batch].T


if __name__ == "__main__":
    key = jax.random.PRNGKey(0)
    k_x, k_w, k_b, k_w3, k_b3 = jax.random.split(key, 5)

    batch, input_dim = 40, 32        # small shapes consistent with the module

    bound = 1.0 / (input_dim ** 0.5)
    weight = jax.random.uniform(k_w, (1, input_dim), jnp.float32, -bound, bound)
    bias = jax.random.uniform(k_b, (1,), jnp.float32, -bound, bound)
    x = jax.random.normal(k_x, (batch, input_dim), jnp.float32)

    ref = x @ weight.T + bias        # plain-JAX reference

    # Auto-tiled path: 2 tiles of 24 rows, last tile partially out of bounds
    # (no wrapper-side padding of x).
    logits = jax.block_until_ready(binary_attribute_head(x, weight, bias))
    assert logits.shape == (batch, 1)
    assert jnp.allclose(logits, ref, atol=1e-5), "mismatch vs reference (auto tile)"

    # Explicit small tile: 3 tiles (16, 16, partial).
    logits_t = jax.block_until_ready(
        binary_attribute_head(x, weight, bias, batch_tile=16))
    assert jnp.allclose(logits_t, ref, atol=1e-5), "mismatch vs reference (batch_tile=16)"

    # Fused multi-head path: 3 binary heads share a single pass over x.
    w3 = jax.random.uniform(k_w3, (3, input_dim), jnp.float32, -bound, bound)
    b3 = jax.random.uniform(k_b3, (3,), jnp.float32, -bound, bound)
    ref3 = x @ w3.T + b3
    logits3 = jax.block_until_ready(binary_attribute_head(x, w3, b3))
    assert logits3.shape == (batch, 3)
    assert jnp.allclose(logits3, ref3, atol=1e-5), "mismatch vs reference (fused heads)"

    print("KERNEL_OK")
</pallas_src>

<mosaic_0001>
module attributes {stable_mosaic.version = 11 : i64} {
  func.func @_binary_head_kernel(%arg0: i32, %arg1: memref<24x32xf32, #tpu.memory_space<vmem>>, %arg2: memref<8x32xf32, #tpu.memory_space<vmem>>, %arg3: memref<1x1xf32, #tpu.memory_space<vmem>>, %arg4: memref<1x1x24xf32, #tpu.memory_space<vmem>>) attributes {dimension_semantics = [#tpu.dimension_semantics<parallel>], iteration_bounds = array<i64: 2>, scalar_prefetch = 0 : i64, scratch_operands = 0 : i64, tpu.core_type = #tpu.core_type<tc>, window_params = [{transform_indices = @transform_0, window_bounds = array<i64: 24, 32>}, {pipeline_mode = #tpu.pipeline_mode<synchronous>, transform_indices = @transform_1, window_bounds = array<i64: 8, 32>}, {pipeline_mode = #tpu.pipeline_mode<synchronous>, transform_indices = @transform_2, window_bounds = array<i64: 1, 1>}, {transform_indices = @transform_3, window_bounds = array<i64: 1, 1, 24>}]} {
    %c0 = arith.constant 0 : index
    %c0_0 = arith.constant 0 : index
    %0 = vector.load %arg2[%c0, %c0_0] : memref<8x32xf32, #tpu.memory_space<vmem>>, vector<8x32xf32>
    %c0_1 = arith.constant 0 : index
    %c0_2 = arith.constant 0 : index
    %1 = vector.load %arg1[%c0_1, %c0_2] : memref<24x32xf32, #tpu.memory_space<vmem>>, vector<24x32xf32>
    %cst = arith.constant dense<0.000000e+00> : vector<8x24xf32>
    %2 = tpu.matmul %0, %1, %cst {dimension_numbers = #tpu.dot_dimension_numbers<[1], [1], [0], [0], [0, 0, 1, 0], [], []>} : vector<8x32xf32>, vector<24x32xf32>, vector<8x24xf32> -> vector<8x24xf32>
    %3 = vector.extract_strided_slice %2 {offsets = [0, 0], sizes = [1, 24], strides = [1, 1]} : vector<8x24xf32> to vector<1x24xf32>
    %c0_3 = arith.constant 0 : index
    %c0_4 = arith.constant 0 : index
    %4 = vector.load %arg3[%c0_3, %c0_4] : memref<1x1xf32, #tpu.memory_space<vmem>>, vector<1x1xf32>
    %5 = vector.broadcast %4 : vector<1x1xf32> to vector<1x24xf32>
    %6 = arith.addf %3, %5 : vector<1x24xf32>
    %7 = vector.shape_cast %6 : vector<1x24xf32> to vector<1x1x24xf32>
    %c0_5 = arith.constant 0 : index
    %c0_6 = arith.constant 0 : index
    %c0_7 = arith.constant 0 : index
    %8 = vector.load %arg4[%c0_5, %c0_6, %c0_7] : memref<1x1x24xf32, #tpu.memory_space<vmem>>, vector<1x1x24xf32>
    tpu.vector_store %arg4[%c0_5, %c0_6, %c0_7], %7 {strides = array<i32>} : memref<1x1x24xf32, #tpu.memory_space<vmem>>, vector<1x1x24xf32>,
    return
  }
  func.func @transform_0(%arg0: i32) -> (i32, i32) {
    %c0_i32 = arith.constant 0 : i32
    %c0_i32_0 = arith.constant 0 : i32
    return %arg0, %c0_i32 : i32, i32
  }
  func.func @transform_1(%arg0: i32) -> (i32, i32) {
    %c0_i32 = arith.constant 0 : i32
    %c0_i32_0 = arith.constant 0 : i32
    %c0_i32_1 = arith.constant 0 : i32
    return %c0_i32, %c0_i32_0 : i32, i32
  }
  func.func @transform_2(%arg0: i32) -> (i32, i32) {
    %c0_i32 = arith.constant 0 : i32
    %c0_i32_0 = arith.constant 0 : i32
    %c0_i32_1 = arith.constant 0 : i32
    return %c0_i32, %c0_i32_0 : i32, i32
  }
  func.func @transform_3(%arg0: i32) -> (i32, i32, i32) {
    %c0_i32 = arith.constant 0 : i32
    %c0_i32_0 = arith.constant 0 : i32
    %c0_i32_1 = arith.constant 0 : i32
    return %arg0, %c0_i32, %c0_i32_0 : i32, i32, i32
  }
}

</mosaic_0001>

<bundles_post_ra>
// kernel: _pallas_forward.1
= control target key start
LH: loop header
LB: loop body
LE: loop exit
PB: predicated region body
PF: predicated region fallthrough
CT: control target
= control target key end

     0   :  { %s612_s0 = inlined_call_operand.vmem [shape: f32[40,32], index: 0, kind: input, shape index: {}]   ;;  %s613_s1 = inlined_call_operand.vmem [shape: f32[8,32], index: 1, kind: input, shape index: {}]   ;;  %s614_s2 = inlined_call_operand.<no memory space> [shape: f32[1,1], index: 2, kind: input, shape index: {}]   ;;  %s615_s3 = inlined_call_operand.hbm [shape: f32[2,1,24], index: 3, kind: output, shape index: {}]  }
   0x1   :  { %v8_v0 = vstv %s614_s2 }
   0x2   :  { %9 = vst [vmem:[#allocation2] sm:$0x1] %v8_v0 }
   0x3   :  { %10 = vsyncpa [#allocation4], 0 }
   0x4   :  { %12 = vsyncpa [#allocation4 + $0x1], 0  ;;  %s517_s14 = smov 0   ;;  %s519_s15 = smov 0  }
   0x5   :  { %s521_s16 = smov 0   ;;  %s523_s17 = smov 0  }
   0x6 LB: > { %s538_s2 = sadd.s32 4294967295, %s488_s17   ;;  %s360_s18 = sadd.s32 4294967294, %s488_s17   ;;  %s488_s17 = sphi %s523_s17, %s621_s17   ;;  %s484_s16 = sphi %s521_s16, %s620_s16   ;;  %s480_s15 = sphi %s519_s15, %s619_s15   ;;  %s476_s14 = sphi %s517_s14, %s618_s14  }
   0x7   : > { %s542_s19 = sadd.s32 1, %s488_s17   ;;  %s93_s20 = sadd.s32 1, %s484_s16 }
   0x8   : > { %s90_s21 = ssub.s32 %s488_s17, %s542_s19  ;;  %p103_p0 = scmp.ne.s32.totalorder %s484_s16, %s480_s15 }
   0x9   : > { %p91_p1 = scmp.eq.s32.totalorder %s90_s21, 0  ;;  %p104_p2 = scmp.eq.s32.totalorder %s538_s2, 1 }
   0xa   : > { %p109_p3 = scmp.ne.s32.totalorder %s480_s15, %s476_s14  ;;  %p110_p4 = scmp.eq.s32.totalorder %s360_s18, 1 }
   0xb   : > { %s553_s22 = scalar_select %p91_p1, %s484_s16, %s93_s20  }
   0xc   : > { %p555_p5 = por %p104_p2, %p103_p0  ;;  %p559_p6 = por %p110_p4, %p109_p3 }
   0xd   : > { %p363_p7 = scmp.ge.s32.totalorder %s488_s17, 1  ;;  %p151_p8 = scmp.lt.s32.totalorder %s488_s17, 3 }
   0xf   : > { %p152_p9 = pnand %p363_p7, %p151_p8 }
  0x10   : > { %s178_s25 = smul.u32 (!%p152_p9), 3, %s538_s2  ;;  %s176_s5 = sand.u32 (!%p152_p9), 1, %s480_s15  }
  0x11   : > { %155 = sbr.rel (%p152_p9) target bundleno = 245 (0xf5), region = 32  ;;  %s369_s6 = sshll.u32 (!%p152_p9), %s538_s2, 4 }
  0x12   : > { %p183_p10 = scmp.lt.s32.totalorder (!%p152_p9), %s178_s25, 4  ;;  %s177_s7 = scalar_lea.vmem (!%p152_p9), [#allocation3], %s176_s5 }
  0x13   : > { %s305_s8 = sshll.u32 (!%p152_p9), %s177_s7, 4  ;;  %s577_s11 = scalar_lea.hbm (!%p152_p9), %s615_s3, %s369_s6  ;;  %s306_s8 = int_to_ptr.vmem [resolvable:$true] %s305_s8 }
  0x14   : > { %s293_s12 = scalar_lea.sflag (!%p152_p9), [#allocation4], %s176_s5  ;;  %s428_s13 = scalar_lea.vmem (!%p152_p9), %s306_s8, 16 }
  0x15   : > { %p429_p11 = scmp.ne.s32.totalorder (!%p152_p9), %s306_s8, %s428_s13  ;;  %s493_s2 = smov (!%p152_p9), [#allocation3]  }
  0x16   : > { %v490_v1 = vmov 0.0   ;;  %vm491_vm0 = vmmov 0   ;;  %v279_v2 = vld [vmem:[#allocation2] sm:$0x1]  ;;  %v492_v3 = vmov 0   ;;  %s623_s25 = smov (!%p183_p10, %s178_s25), 4  ;;  %v285_v8 = vlaneseq }
  0x17   : > { %376 = vmatprep.subr.mxu0 %v490_v1  ;;  %382 = vmatprep.mubr.msk.f32.mxu0 %vm491_vm0, %v490_v1  ;;  %s364_s26 = sshll.u32 %s623_s25, 3  ;;  %vm196_vm1 = vcmask 261120   ;;  %v192_v7 = vld [vmem:[%s613_s1] sm:$0xff]  ;;  %vm290_vm2 = vcmask 188416   ;;  %p430_p12 = pnand %p429_p11, %p555_p5 }
  0x18   : > { %427 = vset.pattern.permute.xlu0 %v492_v3  ;;  %s186_s29 = scalar_lea.vmem %s612_s0, %s364_s26  ;;  %v286_v9 = vshrl.u32 %v285_v8, 7  ;;  %s432_s18 = sshll.u32 %s493_s2, 4  ;;  %s433_s18 = int_to_ptr.vmem [resolvable:$false] %s432_s18 }
  0x19   : > { %282 = vperm.xlu0 %427, %v279_v2   ;;  %v195_v4 = vld [vmem:[%s186_s29 + $0x10] sm:$0xff]  ;;  %v194_v5 = vld [vmem:[%s186_s29 + $0x8] sm:$0xff]  ;;  %v193_v6 = vld [vmem:[%s186_s29] sm:$0xff]  ;;  %p431_p13 = pneg %p430_p12  ;;  %s434_s20 = scalar_lea.vmem %s433_s18, 32 }
  0x1a   : > { %377 = vmatpush3.xpose.msk.msra.mxu0 %vm196_vm1, %v195_v4  ;;  %v287_v10 = vsub.s32 0, %v286_v9  ;;  %p435_p0 = scmp.lt.s32.totalorder %s306_s8, %s433_s18  ;;  %p436_p1 = scmp.lt.s32.totalorder %s434_s20, %s428_s13 }
  0x1b   : > { %378 = vmatprep.subr.mxu0 %v490_v1 }
  0x1c   : > { %p437_p2 = por %p436_p1, %p435_p0 }
  0x1e   : > { %379 = vmatpush3.xpose.msk.msra.mxu0 %vm196_vm1, %v194_v5  ;;  %p438_p3 = pnand %p437_p2, %p431_p13 }
  0x1f   : > { %380 = vmatprep.subr.mxu0 %v490_v1 }
  0x22   : > { %381 = vmatpush3.xpose.msk.msra.mxu0 %vm196_vm1, %v193_v6 }
  0x25   : > { %383 = vmatmul.mubr.msk.f32.vlgmr.msra.gmra.mxu0 %vm196_vm1, %v192_v7 }
  0x94   : > { %v283_v11 = vpop.permute.xlu0 %282 }
  0x95   : > { %v288_v12 = vrot.slane %v283_v11, %v287_v10 }
  0xe5   : > { %v275_v13 = vpop.f32.mrf.mxu0 }
  0xe6   : > { %v289_v14 = vadd.f32 %v288_v12, %v275_v13 }
  0xe7   : > { %v384_v15 = vpop.f32.mrf.mxu0 }
  0xe8   : > { %291 = vst.msk [vmem:[%s177_s7] sm:$0x1] %vm290_vm2, %v289_v14 }
  0xe9   : > { %441 = shalt.err (!%p438_p3)
}
  0xea   : > { %s442_s21 = scalar_lea.hbm %s577_s11, 16  ;;  %s446_s27 = scalar_lea.hbm %s615_s3, 32 }
  0xeb   : > { %p443_p4 = scmp.ne.s32.totalorder %s577_s11, %s442_s21  ;;  %p447_p9 = scmp.lt.s32.totalorder %s577_s11, %s615_s3 }
  0xec   : > { %p448_p10 = scmp.lt.s32.totalorder %s446_s27, %s442_s21 }
  0xed   : > { %p444_p7 = pnand %p443_p4, %p555_p5 }
  0xee   : > { %p449_p11 = por %p448_p10, %p447_p9 }
  0xef   : > { %p445_p8 = pneg %p444_p7 }
  0xf1   : > { %p450_p12 = pnand %p449_p11, %p445_p8 }
  0xf3   : > { %453 = shalt.err (!%p450_p12)
}
  0xf4   : > { %385 = dma.vmem_to_hbm [thread:$0]  (%p555_p5), %s306_s8, 16, %s577_s11, %s293_s12  }
  0xf5 PF: > { %p391_p13 = scmp.ge.s32.totalorder %s488_s17, 2  ;;  %s317_s30 = sand.u32 1, %s476_s14  }
  0xf6   : > { %s318_s4 = scalar_lea.sflag [#allocation4], %s317_s30 }
  0xf7   : > { %p388_p0 = pnand %p391_p13, %p559_p6 }
  0xf9   : > { %p389_p1 = pneg %p388_p0 }
  0xfb   : > { %471 = dma.done.wait (%p389_p1), %s318_s4, 16  }
  0xfc   : > { %473 = vsyncadd (%p389_p1), %s318_s4, 4294967280  ;;  %p15_p2 = scmp.ge.s32.totalorder %s542_s19, 4   ;;  %s618_s14 = smov %s480_s15 }
  0xfd   : > { %s619_s15 = smov %s484_s16  ;;  %s620_s16 = smov %s553_s22 }
  0xfe   : > { %s621_s17 = smov %s542_s19  ;;  %17 = sbr.rel (!%p15_p2) target bundleno = 6 (0x6), region = 67 }
 0x103   :  { %322 = vsyncpa [#allocation4], 1 }
 0x104   :  { %324 = vsyncpa [#allocation4 + $0x1], 1 }

</bundles_post_ra>
